<compile_context>
chip_gen: v6e
topology: v6e:2x2x1
jax: 0.10.0
libtpu: 0.0.40
codegen_flags: <defaults>
</compile_context>

<pallas_src>
import math
import functools

import jax
import jax.numpy as jnp
from jax.experimental import pallas as pl
from jax.experimental.pallas import tpu as pltpu


# ----------------------------- tiling helpers ------------------------------

def _choose_tile(full, target, align):
    """Largest tile <= target that is a multiple of `align` and divides `full`.
    Falls back to the full dimension (always legal for a BlockSpec)."""
    if full <= target:
        return full
    t = (target // align) * align
    while t >= align:
        if full % t == 0:
            return t
        t -= align
    return full


def _shrink(full, cur, align):
    """Next smaller legal tile (divisor of `full`, multiple of `align`), or `cur`."""
    t = cur - align
    while t >= align:
        if full % t == 0:
            return t
        t -= align
    return cur


def _choose_head_tile(H, D, target=256):
    """Largest head-group so h_tile*D <= target and lane-dense (mult of 128)."""
    for ht in range(H, 0, -1):
        if H % ht == 0 and ht * D <= target and (ht * D) % 128 == 0:
            return ht
    return H  # fallback: whole-head group (block width == full last dim)


def _smaller_head_tile(H, D, cur):
    for ht in range(cur - 1, 0, -1):
        if H % ht == 0 and (ht * D) % 128 == 0:
            return ht
    return cur


def _vmem_limit_bytes():
    """Per-generation scoped-VMEM limit: ~3/4 of physical, capped at 64 MiB."""
    cap = 64 * 1024 * 1024
    try:
        cap = int(pltpu.get_tpu_info().vmem_capacity_bytes)
    except Exception:
        pass
    return int(min(cap * 3 // 4, 64 * 1024 * 1024))


def _attn_vmem_bytes(tq, h_tile, Sk, D, in_sz, out_sz):
    """Double-buffered working set estimate for one attention grid step."""
    w = h_tile * D
    return (2 * tq * w * in_sz            # q block (double-buffered)
            + 2 * 2 * Sk * w * in_sz      # k + v blocks (double-buffered)
            + 2 * h_tile * tq * Sk * out_sz   # attn out block
            + 2 * tq * w * out_sz         # ctx out block
            + 4 * tq * Sk * 4)            # live f32 score temporaries


# ----------------------------- linear kernels -------------------------------

def _matmul_bias_kernel(x_ref, w_ref, b_ref, o_ref):
    # Fast path: whole K dimension in one tile -> no accumulator scratch.
    o_ref[...] = (jnp.dot(x_ref[...], w_ref[...],
                          preferred_element_type=jnp.float32)
                  + b_ref[...].astype(jnp.float32)).astype(o_ref.dtype)


def _matmul_acc_kernel(x_ref, w_ref, b_ref, o_ref, acc_ref):
    k = pl.program_id(2)

    @pl.when(k == 0)
    def _():
        acc_ref[...] = jnp.zeros_like(acc_ref)

    acc_ref[...] += jnp.dot(x_ref[...], w_ref[...],
                            preferred_element_type=jnp.float32)

    @pl.when(k == pl.num_programs(2) - 1)
    def _():
        o_ref[...] = (acc_ref[...] + b_ref[...].astype(jnp.float32)
                      ).astype(o_ref.dtype)


def linear(x, w_t, b, *, vmem_limit):
    """y = x @ w_t + b with x:(M, d_in), w_t:(d_in, d_out), b:(d_out,)."""
    M, d_in = x.shape
    d_out = w_t.shape[1]
    isz = jnp.dtype(x.dtype).itemsize
    row_align = 16 if x.dtype == jnp.bfloat16 else 8
    budget = vmem_limit // 2

    tm = _choose_tile(M, 512, row_align)
    tn = _choose_tile(d_out, 512, 128)
    tk = _choose_tile(d_in, 1024 if isz == 2 else 512, 128)

    def working_set(tm_, tn_, tk_):
        return (2 * (tm_ * tk_ + tk_ * tn_) * isz   # double-buffered inputs
                + tm_ * tn_ * 4                     # f32 accumulator
                + 2 * tm_ * tn_ * isz               # double-buffered output
                + 2 * tn_ * isz)                    # bias

    for _ in range(64):
        if working_set(tm, tn, tk) <= budget:
            break
        if tk >= max(tm, tn) and _shrink(d_in, tk, 128) != tk:
            tk = _shrink(d_in, tk, 128)
            continue
        if tn >= tm and _shrink(d_out, tn, 128) != tn:
            tn = _shrink(d_out, tn, 128)
            continue
        nm = _shrink(M, tm, row_align)
        if nm != tm:
            tm = nm
            continue
        break

    kt = d_in // tk
    b2 = b.reshape(1, d_out)

    if kt == 1:
        return pl.pallas_call(
            _matmul_bias_kernel,
            out_shape=jax.ShapeDtypeStruct((M, d_out), x.dtype),
            grid=(M // tm, d_out // tn),
            in_specs=[
                pl.BlockSpec((tm, tk), lambda i, j: (i, 0)),
                pl.BlockSpec((tk, tn), lambda i, j: (0, j)),
                pl.BlockSpec((1, tn), lambda i, j: (0, j)),
            ],
            out_specs=pl.BlockSpec((tm, tn), lambda i, j: (i, j)),
            compiler_params=pltpu.CompilerParams(
                dimension_semantics=("parallel", "parallel"),
                vmem_limit_bytes=vmem_limit),
        )(x, w_t, b2)

    return pl.pallas_call(
        _matmul_acc_kernel,
        out_shape=jax.ShapeDtypeStruct((M, d_out), x.dtype),
        grid=(M // tm, d_out // tn, kt),
        in_specs=[
            pl.BlockSpec((tm, tk), lambda i, j, k: (i, k)),
            pl.BlockSpec((tk, tn), lambda i, j, k: (k, j)),
            pl.BlockSpec((1, tn), lambda i, j, k: (0, j)),
        ],
        out_specs=pl.BlockSpec((tm, tn), lambda i, j, k: (i, j)),
        scratch_shapes=[pltpu.VMEM((tm, tn), jnp.float32)],
        compiler_params=pltpu.CompilerParams(
            dimension_semantics=("parallel", "parallel", "arbitrary"),
            vmem_limit_bytes=vmem_limit),
    )(x, w_t, b2)


# ---------------------------- attention kernel -----------------------------

def _attn_kernel(q_ref, k_ref, v_ref, ctx_ref, attn_ref, *, scale, h_tile, D):
    # q_ref: (tq, h_tile*D); k_ref/v_ref: (Sk, h_tile*D)  — head-major columns.
    # ctx_ref: (tq, h_tile*D) lane-dense final layout; attn_ref: (h_tile, tq, Sk).
    for h in range(h_tile):
        c0 = h * D
        q_h = q_ref[:, c0:c0 + D]
        k_h = k_ref[:, c0:c0 + D]
        v_h = v_ref[:, c0:c0 + D]

        # scores: contract q/k on their last axes (no explicit K transpose),
        # f32 accumulation on the MXU.
        s = jax.lax.dot_general(
            q_h, k_h, dimension_numbers=(((1,), (1,)), ((), ())),
            preferred_element_type=jnp.float32) * scale

        # numerically stable softmax in f32, exact normalization.
        m = jnp.max(s, axis=-1, keepdims=True)
        e = jnp.exp(s - m)
        p = e / jnp.sum(e, axis=-1, keepdims=True)

        attn_ref[h] = p.astype(attn_ref.dtype)

        ctx_h = jnp.dot(p.astype(v_h.dtype), v_h,
                        preferred_element_type=jnp.float32)
        # fill the lane-dense output block; HBM writeback DMA is fully dense.
        ctx_ref[:, c0:c0 + D] = ctx_h.astype(ctx_ref.dtype)


def _attention_call(q_src, k_src, v_src, *, B, Sq, Sk, H, D, h_tile, tq,
                    q_col0, k_col0, v_col0, out_dtype, vmem_limit, scale):
    """q_src:(B,Sq,C), k_src/v_src:(B,Sk,C); column-block offsets select Q/K/V.
    Returns ctx:(B,Sq,H*D) (final layout, no post-transpose) and attn:(H,B,Sq,Sk)."""
    W = h_tile * D
    grid = (H // h_tile, B, Sq // tq)
    kernel = functools.partial(_attn_kernel, scale=scale, h_tile=h_tile, D=D)

    return pl.pallas_call(
        kernel,
        out_shape=(
            jax.ShapeDtypeStruct((B, Sq, H * D), out_dtype),
            jax.ShapeDtypeStruct((H, B, Sq, Sk), out_dtype),
        ),
        grid=grid,
        in_specs=[
            pl.BlockSpec((None, tq, W), lambda hj, b, qi: (b, qi, q_col0 + hj)),
            pl.BlockSpec((None, Sk, W), lambda hj, b, qi: (b, 0, k_col0 + hj)),
            pl.BlockSpec((None, Sk, W), lambda hj, b, qi: (b, 0, v_col0 + hj)),
        ],
        out_specs=(
            pl.BlockSpec((None, tq, W), lambda hj, b, qi: (b, qi, hj)),
            pl.BlockSpec((h_tile, None, tq, Sk), lambda hj, b, qi: (hj, b, qi, 0)),
        ),
        # qi marked "arbitrary" so a megacore split lands on hj/b and the two
        # TensorCores do not each re-DMA the same resident K/V blocks.
        compiler_params=pltpu.CompilerParams(
            dimension_semantics=("parallel", "parallel", "arbitrary"),
            vmem_limit_bytes=vmem_limit),
    )(q_src, k_src, v_src)


# ----------------------------- module wrapper ------------------------------

def init_mha_params(key, d_model, n_heads, dtype=jnp.float32):
    assert d_model % n_heads == 0
    ks = jax.random.split(key, 6)
    scale = 1.0 / math.sqrt(d_model)  # deterministic small-uniform init

    def w(k):
        return jax.random.uniform(k, (d_model, d_model), dtype, -scale, scale)

    def b(k):
        return jax.random.uniform(k, (d_model,), dtype, -scale, scale)

    return {
        "wq": w(ks[0]), "bq": b(ks[1]),
        "wk": w(ks[2]), "bk": b(ks[3]),
        "wv": w(ks[4]), "bv": b(ks[5]),
    }


def prepare_mha_params(params):
    """One-time prep (off the per-call path): weights in (in,out) layout plus
    the fused QKV weight/bias for the self-attention single-GEMM path."""
    wq_t = params["wq"].T
    wk_t = params["wk"].T
    wv_t = params["wv"].T
    return {
        "wq_t": wq_t, "wk_t": wk_t, "wv_t": wv_t,
        "bq": params["bq"], "bk": params["bk"], "bv": params["bv"],
        "w_qkv_t": jnp.concatenate([wq_t, wk_t, wv_t], axis=1),
        "b_qkv": jnp.concatenate([params["bq"], params["bk"], params["bv"]]),
    }


def multi_head_attention(q, k, v, prepared, n_heads, mask=None):
    """q,k,v: (B, S, d_model). Returns (context (B,Sq,d_model), attn (B*H,Sq,Sk))."""
    # TODO(synk): mask path of masked_fill_(-inf) not wired into the kernel; mask must be None.
    assert mask is None
    B, Sq, d_model = q.shape
    Sk = k.shape[1]
    H = n_heads
    D = d_model // H
    dt = q.dtype
    isz = jnp.dtype(dt).itemsize

    vmem_limit = _vmem_limit_bytes()
    budget = vmem_limit // 2
    row_align = 16 if dt == jnp.bfloat16 else 8

    # Head-group and query-tile selection under a per-generation VMEM budget.
    h_tile = _choose_head_tile(H, D)
    tq = _choose_tile(Sq, 256, row_align)
    for _ in range(64):
        if _attn_vmem_bytes(tq, h_tile, Sk, D, isz, isz) <= budget:
            break
        nt = _shrink(Sq, tq, row_align)
        if nt != tq:
            tq = nt
            continue
        nh = _smaller_head_tile(H, D, h_tile)
        if nh == h_tile:
            break
        h_tile = nh
    W = h_tile * D

    # Self-attention: single fused QKV GEMM, and the attention kernel indexes
    # straight into the fused GEMM output via column offsets (no slices, no
    # split_heads transpose). Object-identity check; equal-but-distinct arrays
    # fall back to three GEMMs (still correct).
    fuse = (q is k) and (k is v) and (W % 128 == 0)
    if fuse:
        y = linear(q.reshape(B * Sq, d_model), prepared["w_qkv_t"],
                   prepared["b_qkv"], vmem_limit=vmem_limit)
        y3 = y.reshape(B, Sq, 3 * d_model)          # free reshape
        q_src = k_src = v_src = y3
        q_col0, k_col0, v_col0 = 0, d_model // W, 2 * d_model // W
    else:
        yq = linear(q.reshape(B * Sq, d_model), prepared["wq_t"], prepared["bq"],
                    vmem_limit=vmem_limit)
        yk = linear(k.reshape(B * Sk, d_model), prepared["wk_t"], prepared["bk"],
                    vmem_limit=vmem_limit)
        yv = linear(v.reshape(B * Sk, d_model), prepared["wv_t"], prepared["bv"],
                    vmem_limit=vmem_limit)
        q_src = yq.reshape(B, Sq, d_model)          # free reshapes, no transpose
        k_src = yk.reshape(B, Sk, d_model)
        v_src = yv.reshape(B, Sk, d_model)
        q_col0 = k_col0 = v_col0 = 0

    ctx, attn4 = _attention_call(
        q_src, k_src, v_src, B=B, Sq=Sq, Sk=Sk, H=H, D=D, h_tile=h_tile, tq=tq,
        q_col0=q_col0, k_col0=k_col0, v_col0=v_col0,
        out_dtype=dt, vmem_limit=vmem_limit, scale=1.0 / math.sqrt(D))

    # ctx is already in its final lane-dense (B, Sq, H*D) layout.
    # attn leading-dim reshape (H,B,Sq,Sk) -> (H*B,Sq,Sk) is free.
    # NOTE: attn is returned in the input dtype (f32 here); for bf16 inputs
    # this keeps the dominant HBM writeback narrow (documented trade-off).
    attn = attn4.reshape(H * B, Sq, Sk)
    # TODO(synk): source's `return context.attn` is a typo; intended (context, attn) returned.
    return ctx, attn


# -------------------------- reference (plain JAX) ---------------------------

def _reference(q, k, v, params, n_heads):
    B, Sq, d_model = q.shape
    D = d_model // n_heads

    def proj(x, w, b_):
        y = x @ w.T + b_
        y = y.reshape(x.shape[0], x.shape[1], n_heads, D)
        return jnp.transpose(y, (2, 0, 1, 3)).reshape(
            n_heads * x.shape[0], x.shape[1], D)

    Q = proj(q, params["wq"], params["bq"])
    K = proj(k, params["wk"], params["bk"])
    V = proj(v, params["wv"], params["bv"])
    score = jnp.einsum("bqd,bkd->bqk", Q, K) / math.sqrt(D)
    attn = jax.nn.softmax(score, axis=-1)
    ctx = jnp.einsum("bqk,bkd->bqd", attn, V)
    ctx = ctx.reshape(n_heads, B, Sq, D)
    ctx = jnp.transpose(ctx, (1, 2, 0, 3)).reshape(B, Sq, d_model)
    return ctx, attn


# ---------------------------------- main ------------------------------------

if __name__ == "__main__":
    def run_case(B, S, d_model, n_heads, self_attn, key):
        kq, kk, kv, kp = jax.random.split(key, 4)
        q = jax.random.normal(kq, (B, S, d_model), jnp.float32)
        if self_attn:
            k = q
            v = q
        else:
            k = jax.random.normal(kk, (B, S, d_model), jnp.float32)
            v = jax.random.normal(kv, (B, S, d_model), jnp.float32)
        params = init_mha_params(kp, d_model, n_heads)
        prepared = prepare_mha_params(params)   # once per module, not per call

        context, attn = multi_head_attention(q, k, v, prepared, n_heads)
        context = jax.block_until_ready(context)
        attn = jax.block_until_ready(attn)

        ref_ctx, ref_attn = _reference(q, k, v, params, n_heads)
        assert context.shape == (B, S, d_model)
        assert attn.shape == (B * n_heads, S, S)
        assert jnp.allclose(context, ref_ctx, atol=2e-3, rtol=2e-3), \
            float(jnp.max(jnp.abs(context - ref_ctx)))
        assert jnp.allclose(attn, ref_attn, atol=2e-3, rtol=2e-3), \
            float(jnp.max(jnp.abs(attn - ref_attn)))

    root = jax.random.PRNGKey(0)
    k1, k2 = jax.random.split(root)

    # Small cross-attention-style case (distinct q/k/v): per-input projection path,
    # whole-head group (block width == full last dim).
    run_case(B=2, S=8, d_model=32, n_heads=4, self_attn=False, key=k1)
    # Module-default-sized self-attention case: fused QKV GEMM, attention fed
    # directly from the fused GEMM output via column-offset index_maps,
    # lane-dense 256-wide context blocks, two head-groups.
    run_case(B=2, S=16, d_model=512, n_heads=8, self_attn=True, key=k2)

    print("KERNEL_OK")
</pallas_src>

<mosaic_0001>
module attributes {stable_mosaic.version = 11 : i64} {
  func.func @_matmul_bias_kernel(%arg0: i32, %arg1: i32, %arg2: memref<16x32xf32, #tpu.memory_space<vmem>>, %arg3: memref<32x32xf32, #tpu.memory_space<vmem>>, %arg4: memref<1x32xf32, #tpu.memory_space<vmem>>, %arg5: memref<16x32xf32, #tpu.memory_space<vmem>>) attributes {dimension_semantics = [#tpu.dimension_semantics<parallel>, #tpu.dimension_semantics<parallel>], iteration_bounds = array<i64: 1, 1>, scalar_prefetch = 0 : i64, scratch_operands = 0 : i64, tpu.core_type = #tpu.core_type<tc>, window_params = [{transform_indices = @transform_0, window_bounds = array<i64: 16, 32>}, {transform_indices = @transform_1, window_bounds = array<i64: 32, 32>}, {transform_indices = @transform_2, window_bounds = array<i64: 1, 32>}, {transform_indices = @transform_3, window_bounds = array<i64: 16, 32>}]} {
    %c0 = arith.constant 0 : index
    %c0_0 = arith.constant 0 : index
    %0 = vector.load %arg2[%c0, %c0_0] : memref<16x32xf32, #tpu.memory_space<vmem>>, vector<16x32xf32>
    %c0_1 = arith.constant 0 : index
    %c0_2 = arith.constant 0 : index
    %1 = vector.load %arg3[%c0_1, %c0_2] : memref<32x32xf32, #tpu.memory_space<vmem>>, vector<32x32xf32>
    %cst = arith.constant dense<0.000000e+00> : vector<16x32xf32>
    %2 = tpu.matmul %0, %1, %cst {dimension_numbers = #tpu.dot_dimension_numbers<[1], [0], [0], [1], [0, 0, 1, 1], [], []>} : vector<16x32xf32>, vector<32x32xf32>, vector<16x32xf32> -> vector<16x32xf32>
    %c0_3 = arith.constant 0 : index
    %c0_4 = arith.constant 0 : index
    %3 = vector.load %arg4[%c0_3, %c0_4] : memref<1x32xf32, #tpu.memory_space<vmem>>, vector<1x32xf32>
    %4 = vector.broadcast %3 : vector<1x32xf32> to vector<16x32xf32>
    %5 = arith.addf %2, %4 : vector<16x32xf32>
    %c0_5 = arith.constant 0 : index
    %c0_6 = arith.constant 0 : index
    %6 = vector.load %arg5[%c0_5, %c0_6] : memref<16x32xf32, #tpu.memory_space<vmem>>, vector<16x32xf32>
    tpu.vector_store %arg5[%c0_5, %c0_6], %5 {strides = array<i32>} : memref<16x32xf32, #tpu.memory_space<vmem>>, vector<16x32xf32>,
    return
  }
  func.func @transform_0(%arg0: i32, %arg1: i32) -> (i32, i32) {
    %c0_i32 = arith.constant 0 : i32
    %c0_i32_0 = arith.constant 0 : i32
    return %arg0, %c0_i32 : i32, i32
  }
  func.func @transform_1(%arg0: i32, %arg1: i32) -> (i32, i32) {
    %c0_i32 = arith.constant 0 : i32
    %c0_i32_0 = arith.constant 0 : i32
    return %c0_i32, %arg1 : i32, i32
  }
  func.func @transform_2(%arg0: i32, %arg1: i32) -> (i32, i32) {
    %c0_i32 = arith.constant 0 : i32
    %c0_i32_0 = arith.constant 0 : i32
    return %c0_i32, %arg1 : i32, i32
  }
  func.func @transform_3(%arg0: i32, %arg1: i32) -> (i32, i32) {
    %c0_i32 = arith.constant 0 : i32
    return %arg0, %arg1 : i32, i32
  }
}

</mosaic_0001>

<bundles_post_ra>
// kernel: tpu_custom_call.1
= control target key start
LH: loop header
LB: loop body
LE: loop exit
PB: predicated region body
PF: predicated region fallthrough
CT: control target
= control target key end

     0   :  { %8 = vsyncpa [#allocation3], 0  ;;  %s299_s0 = inlined_call_operand.hbm [shape: f32[16,32], index: 0, kind: input, shape index: {}]   ;;  %s300_s1 = inlined_call_operand.hbm [shape: f32[32,32], index: 1, kind: input, shape index: {}]   ;;  %s301_s2 = inlined_call_operand.vmem [shape: f32[1,32], index: 2, kind: input, shape index: {}]   ;;  %s302_s3 = inlined_call_operand.hbm [shape: f32[16,32], index: 3, kind: output, shape index: {}]  }
   0x1   :  { %9 = vsyncpa [#allocation6], 0 }
   0x2   :  { %10 = vsyncpa [#allocation4], 0  ;;  %s249_s12 = smov [#allocation2]  }
   0x3   :  { %s16_s13 = sshll.u32 %s249_s12, 4  ;;  %s17_s13 = int_to_ptr.vmem [resolvable:$true] %s16_s13 }
   0x4   :  { %s191_s14 = scalar_lea.vmem %s17_s13, 256  ;;  %p196_p1 = scmp.lt.s32.totalorder %s17_s13, %s17_s13 }
   0x5   :  { %p192_p0 = scmp.ne.s32.totalorder %s17_s13, %s191_s14  ;;  %p197_p2 = scmp.lt.s32.totalorder %s191_s14, %s191_s14 }
   0x7   :  { %p198_p3 = por %p197_p2, %p196_p1 }
   0x9   :  { %p199_p4 = pnand %p198_p3, %p192_p0 }
   0xb   :  { %202 = shalt.err (!%p199_p4)
}
   0xc   :  { %s250_s15 = smov 128   ;;  %s251_s16 = smov 8  }
   0xd   :  { %22 = dma.hbm_to_vmem [thread:$0]  %s299_s0, 256, %s17_s13, [#allocation3], %s250_s15, %s250_s15, %s251_s16  }
   0xe   :  { %s252_s19 = smov [#allocation5]  }
   0xf   :  { %s28_s20 = sshll.u32 %s252_s19, 4  ;;  %s29_s20 = int_to_ptr.vmem [resolvable:$true] %s28_s20 }
  0x10   :  { %s211_s21 = scalar_lea.vmem %s29_s20, 512  ;;  %p216_p6 = scmp.lt.s32.totalorder %s29_s20, %s29_s20 }
  0x11   :  { %p212_p5 = scmp.ne.s32.totalorder %s29_s20, %s211_s21  ;;  %p217_p7 = scmp.lt.s32.totalorder %s211_s21, %s211_s21 }
  0x13   :  { %p218_p8 = por %p217_p7, %p216_p6 }
  0x15   :  { %p219_p9 = pnand %p218_p8, %p212_p5 }
  0x17   :  { %222 = shalt.err (!%p219_p9)
}
  0x18   :  { %34 = dma.hbm_to_vmem [thread:$0]  %s300_s1, 512, %s29_s20, [#allocation6], %s250_s15, %s250_s15, %s251_s16  }
  0x19   :  { %243 = dma.done.wait [#allocation3], 256  }
  0x1a   :  { %244 = vsyncadd [#allocation3], 4294967040 }
  0x1b   :  { %245 = dma.done.wait [#allocation6], 512  }
  0x1c   :  { %246 = vsyncadd [#allocation6], 4294966784  ;;  %vm56_vm0 = vcmask 261120   ;;  %v48_v0 = vld [vmem:[#allocation5 + $0x18] sm:$0xff]  ;;  %v47_v1 = vld [vmem:[#allocation5 + $0x10] sm:$0xff]  ;;  %s253_s24 = smov [#allocation7]  }
  0x1d   :  { %167 = vmatprep.subr.mxu0 %v48_v0  ;;  %v43_v2 = vld [vmem:[#allocation2] sm:$0xff]  ;;  %v46_v3 = vld [vmem:[#allocation5 + $0x8] sm:$0xff]  ;;  %v45_v4 = vld [vmem:[#allocation5] sm:$0xff]  ;;  %s145_s25 = sshll.u32 %s253_s24, 4  ;;  %s146_s25 = int_to_ptr.vmem [resolvable:$true] %s145_s25 }
  0x1e   :  { %168 = vmatpush3.msra.mxu0 %v48_v0  ;;  %175 = vmatprep.mubr.msk.f32.mxu0 %vm56_vm0, %v43_v2  ;;  %v44_v5 = vld [vmem:[#allocation2 + $0x8] sm:$0xff]  ;;  %v158_v6 = vld [vmem:[%s301_s2] ss:$0 sm:$0xff]  ;;  %s223_s26 = scalar_lea.vmem %s146_s25, 256  ;;  %p228_p11 = scmp.lt.s32.totalorder %s146_s25, %s146_s25 }
  0x1f   :  { %169 = vmatprep.subr.mxu0 %v47_v1  ;;  %p224_p10 = scmp.ne.s32.totalorder %s146_s25, %s223_s26  ;;  %p229_p12 = scmp.lt.s32.totalorder %s223_s26, %s223_s26 }
  0x20   :  { %170 = vmatpush3.msra.mxu0 %v47_v1 }
  0x21   :  { %171 = vmatprep.subr.mxu0 %v46_v3  ;;  %p230_p13 = por %p229_p12, %p228_p11 }
  0x22   :  { %172 = vmatpush3.msra.mxu0 %v46_v3 }
  0x23   :  { %173 = vmatprep.subr.mxu0 %v45_v4  ;;  %p231_p0 = pnand %p230_p13, %p224_p10 }
  0x24   :  { %174 = vmatpush3.msra.mxu0 %v45_v4 }
  0x25   :  { %176 = vmatmul.mubr.msk.f32.vlgmr.msra.gmra.mxu0 %vm56_vm0, %v44_v5 }
  0xe5   :  { %v177_v7 = vpop.f32.mrf.mxu0 }
  0xe6   :  { %v135_v8 = vadd.f32 %v177_v7, %v158_v6 }
  0xe7   :  { %v129_v9 = vpop.f32.mrf.mxu0 }
  0xe8   :  { %139 = vst.msk [vmem:[#allocation7 + $0x8] sm:$0xff] %vm56_vm0, %v135_v8  ;;  %v130_v10 = vadd.f32 %v158_v6, %v129_v9 }
  0xea   :  { %138 = vst.msk [vmem:[#allocation7] sm:$0xff] %vm56_vm0, %v130_v10 }
  0xeb   :  { %234 = shalt.err (!%p231_p0)
}
  0xec   :  { %151 = dma.vmem_to_hbm [thread:$0]  %s146_s25, 256, %s302_s3, [#allocation4], %s250_s15, %s250_s15, %s251_s16  }
  0xed   :  { %247 = dma.done.wait [#allocation4], 256  }
  0xee   :  { %248 = vsyncadd [#allocation4], 4294967040 }
  0xef   :  { %155 = vsyncpa [#allocation3], 1 }
  0xf0   :  { %156 = vsyncpa [#allocation6], 1 }
  0xf1   :  { %157 = vsyncpa [#allocation4], 1 }

</bundles_post_ra>
